<compile_context>
chip_gen: v7x
topology: tpu7x:2x2x1
jax: 0.10.0
libtpu: 0.0.40
codegen_flags: <defaults>
</compile_context>

<pallas_src>
import jax
import jax.numpy as jnp
from jax.experimental import pallas as pl
from jax.experimental.pallas import tpu as pltpu


def path_encoder_kernel(x_ref, w_ref, u_ref, b1_ref, b2_ref, out_ref, hid_ref):
    # x_ref:   (B, F)  last path only (Pallas DMAs data[S-1] via the index_map)
    # w_ref:   (F, H)  W.weight stored [in, out]
    # u_ref:   (H, H)  U.weight stored [in, out]
    # b1_ref:  (1, H)  W.bias + bias1 (folded once at init)
    # b2_ref:  (1, H)  U.bias + bias2 (folded once at init)
    # out_ref: (B, H)  Out
    # hid_ref: (B, H)  Hidden (the module's h_state)
    h = jnp.dot(x_ref[...], w_ref[...], preferred_element_type=jnp.float32)
    h = jnp.maximum(h + b1_ref[...], 0.0)                      # ReLU
    hid_ref[...] = h
    out_ref[...] = (
        jnp.dot(h, u_ref[...], preferred_element_type=jnp.float32) + b2_ref[...]
    )


def prepare_params(w, wb, u, ub, b1, b2):
    """One-time parameter prep — call at INIT, never per forward call.

    Folds the two bias pairs and fixes dtypes.  Weights are already stored
    [in, out], so no transpose is needed here either.
    """
    f32 = jnp.float32
    return (
        jnp.asarray(w, f32),          # (F, H)
        jnp.asarray(u, f32),          # (H, H)
        jnp.asarray(wb + b1, f32),    # (1, H)
        jnp.asarray(ub + b2, f32),    # (1, H)
    )


def path_encoder(data, params):
    """data: (S, B, F) float32. Returns (Out.squeeze(), Hidden) of the last path."""
    wT, uT, bf1, bf2 = params
    S, B, F = data.shape
    H = wT.shape[1]
    assert S >= 1, "PathEncoder requires at least one path (S >= 1)"

    out, hidden = pl.pallas_call(
        path_encoder_kernel,
        out_shape=(
            jax.ShapeDtypeStruct((B, H), jnp.float32),   # Out
            jax.ShapeDtypeStruct((B, H), jnp.float32),   # Hidden (h_state)
        ),
        grid=(1,),
        in_specs=[
            # Only the last path matters: DMA just data[S-1] into VMEM.
            pl.BlockSpec((pl.Squeezed(), B, F), lambda i: (S - 1, 0, 0)),
            pl.BlockSpec((F, H), lambda i: (0, 0)),
            pl.BlockSpec((H, H), lambda i: (0, 0)),
            pl.BlockSpec((1, H), lambda i: (0, 0)),
            pl.BlockSpec((1, H), lambda i: (0, 0)),
        ],
        out_specs=(
            pl.BlockSpec((B, H), lambda i: (0, 0)),
            pl.BlockSpec((B, H), lambda i: (0, 0)),
        ),
        compiler_params=pltpu.CompilerParams(
            dimension_semantics=("arbitrary",)
        ),
    )(data, wT, uT, bf1, bf2)

    return jnp.squeeze(out), hidden


def init_params(key, in_features=7, hidden=32):
    """Deterministic init mirroring the module's __init__ shapes.

    Linear layers use PyTorch-style uniform(-1/sqrt(fan_in), 1/sqrt(fan_in));
    bias1/bias2 use normal(mean=0, std=0.5) as in the module.
    Weights are generated directly in [in, out] layout.
    """
    k = jax.random.split(key, 6)
    kw = 1.0 / jnp.sqrt(float(in_features))
    ku = 1.0 / jnp.sqrt(float(hidden))
    w = jax.random.uniform(k[0], (in_features, hidden), jnp.float32, -kw, kw)
    wb = jax.random.uniform(k[1], (1, hidden), jnp.float32, -kw, kw)
    u = jax.random.uniform(k[2], (hidden, hidden), jnp.float32, -ku, ku)
    ub = jax.random.uniform(k[3], (1, hidden), jnp.float32, -ku, ku)
    b1 = 0.5 * jax.random.normal(k[4], (1, hidden), jnp.float32)
    b2 = 0.5 * jax.random.normal(k[5], (1, hidden), jnp.float32)
    return w, wb, u, ub, b1, b2


if __name__ == "__main__":
    key = jax.random.PRNGKey(0)
    k_data, k_params = jax.random.split(key)

    S, B, F, H = 8, 4, 7, 32            # seq of 8 paths, batch 4, input 7, hidden 32
    data = jax.random.normal(k_data, (S, B, F), jnp.float32)
    w, wb, u, ub, b1, b2 = init_params(k_params, F, H)

    # Hoisted one-time prep (bias folding) — not part of the per-call path.
    params = prepare_params(w, wb, u, ub, b1, b2)

    out, hidden = path_encoder(data, params)
    out = jax.block_until_ready(out)

    # Pure-JAX reference of the PyTorch forward (only the last path matters).
    h_ref = jnp.maximum(data[-1] @ w + wb + b1, 0.0)
    ref = jnp.squeeze(h_ref @ u + ub + b2)
    assert out.shape == ref.shape == (B, H)
    assert jnp.allclose(out, ref, atol=1e-5, rtol=1e-5)
    assert jnp.allclose(hidden, h_ref, atol=1e-5, rtol=1e-5)

    print("KERNEL_OK")
</pallas_src>

<mosaic_0001>
module attributes {stable_mosaic.version = 11 : i64} {
  func.func @path_encoder_kernel(%arg0: i32, %arg1: memref<1x4x7xf32, #tpu.memory_space<vmem>>, %arg2: memref<7x32xf32, #tpu.memory_space<vmem>>, %arg3: memref<32x32xf32, #tpu.memory_space<vmem>>, %arg4: memref<1x32xf32, #tpu.memory_space<vmem>>, %arg5: memref<1x32xf32, #tpu.memory_space<vmem>>, %arg6: memref<4x32xf32, #tpu.memory_space<vmem>>, %arg7: memref<4x32xf32, #tpu.memory_space<vmem>>) attributes {dimension_semantics = [#tpu.dimension_semantics<arbitrary>], iteration_bounds = array<i64: 1>, scalar_prefetch = 0 : i64, scratch_operands = 0 : i64, tpu.core_type = #tpu.core_type<tc>, window_params = [{transform_indices = @transform_0, window_bounds = array<i64: 1, 4, 7>}, {pipeline_mode = #tpu.pipeline_mode<synchronous>, transform_indices = @transform_1, window_bounds = array<i64: 7, 32>}, {pipeline_mode = #tpu.pipeline_mode<synchronous>, transform_indices = @transform_2, window_bounds = array<i64: 32, 32>}, {pipeline_mode = #tpu.pipeline_mode<synchronous>, transform_indices = @transform_3, window_bounds = array<i64: 1, 32>}, {pipeline_mode = #tpu.pipeline_mode<synchronous>, transform_indices = @transform_4, window_bounds = array<i64: 1, 32>}, {pipeline_mode = #tpu.pipeline_mode<synchronous>, transform_indices = @transform_5, window_bounds = array<i64: 4, 32>}, {pipeline_mode = #tpu.pipeline_mode<synchronous>, transform_indices = @transform_6, window_bounds = array<i64: 4, 32>}]} {
    %c0 = arith.constant 0 : index
    %c0_0 = arith.constant 0 : index
    %c0_1 = arith.constant 0 : index
    %0 = vector.load %arg1[%c0, %c0_0, %c0_1] : memref<1x4x7xf32, #tpu.memory_space<vmem>>, vector<1x4x7xf32>
    %1 = vector.shape_cast %0 : vector<1x4x7xf32> to vector<4x7xf32>
    %c0_2 = arith.constant 0 : index
    %c0_3 = arith.constant 0 : index
    %2 = vector.load %arg2[%c0_2, %c0_3] : memref<7x32xf32, #tpu.memory_space<vmem>>, vector<7x32xf32>
    %cst = arith.constant dense<0.000000e+00> : vector<4x32xf32>
    %3 = tpu.matmul %1, %2, %cst {dimension_numbers = #tpu.dot_dimension_numbers<[1], [0], [0], [1], [0, 0, 1, 1], [], []>} : vector<4x7xf32>, vector<7x32xf32>, vector<4x32xf32> -> vector<4x32xf32>
    %c0_4 = arith.constant 0 : index
    %c0_5 = arith.constant 0 : index
    %4 = vector.load %arg4[%c0_4, %c0_5] : memref<1x32xf32, #tpu.memory_space<vmem>>, vector<1x32xf32>
    %5 = vector.broadcast %4 : vector<1x32xf32> to vector<4x32xf32>
    %6 = arith.addf %3, %5 : vector<4x32xf32>
    %cst_6 = arith.constant 0.000000e+00 : f32
    %7 = vector.broadcast %cst_6 : f32 to vector<4x32xf32>
    %8 = arith.maximumf %6, %7 : vector<4x32xf32>
    %c0_7 = arith.constant 0 : index
    %c0_8 = arith.constant 0 : index
    %9 = vector.load %arg7[%c0_7, %c0_8] : memref<4x32xf32, #tpu.memory_space<vmem>>, vector<4x32xf32>
    tpu.vector_store %arg7[%c0_7, %c0_8], %8 {strides = array<i32>} : memref<4x32xf32, #tpu.memory_space<vmem>>, vector<4x32xf32>,
    %c0_9 = arith.constant 0 : index
    %c0_10 = arith.constant 0 : index
    %10 = vector.load %arg3[%c0_9, %c0_10] : memref<32x32xf32, #tpu.memory_space<vmem>>, vector<32x32xf32>
    %cst_11 = arith.constant dense<0.000000e+00> : vector<4x32xf32>
    %11 = tpu.matmul %8, %10, %cst_11 {dimension_numbers = #tpu.dot_dimension_numbers<[1], [0], [0], [1], [0, 0, 1, 1], [], []>} : vector<4x32xf32>, vector<32x32xf32>, vector<4x32xf32> -> vector<4x32xf32>
    %c0_12 = arith.constant 0 : index
    %c0_13 = arith.constant 0 : index
    %12 = vector.load %arg5[%c0_12, %c0_13] : memref<1x32xf32, #tpu.memory_space<vmem>>, vector<1x32xf32>
    %13 = vector.broadcast %12 : vector<1x32xf32> to vector<4x32xf32>
    %14 = arith.addf %11, %13 : vector<4x32xf32>
    %c0_14 = arith.constant 0 : index
    %c0_15 = arith.constant 0 : index
    %15 = vector.load %arg6[%c0_14, %c0_15] : memref<4x32xf32, #tpu.memory_space<vmem>>, vector<4x32xf32>
    tpu.vector_store %arg6[%c0_14, %c0_15], %14 {strides = array<i32>} : memref<4x32xf32, #tpu.memory_space<vmem>>, vector<4x32xf32>,
    return
  }
  func.func @transform_0(%arg0: i32) -> (i32, i32, i32) {
    %c7_i32 = arith.constant 7 : i32
    %c0_i32 = arith.constant 0 : i32
    %c0_i32_0 = arith.constant 0 : i32
    %c0_i32_1 = arith.constant 0 : i32
    return %c7_i32, %c0_i32, %c0_i32_0 : i32, i32, i32
  }
  func.func @transform_1(%arg0: i32) -> (i32, i32) {
    %c0_i32 = arith.constant 0 : i32
    %c0_i32_0 = arith.constant 0 : i32
    %c0_i32_1 = arith.constant 0 : i32
    return %c0_i32, %c0_i32_0 : i32, i32
  }
  func.func @transform_2(%arg0: i32) -> (i32, i32) {
    %c0_i32 = arith.constant 0 : i32
    %c0_i32_0 = arith.constant 0 : i32
    %c0_i32_1 = arith.constant 0 : i32
    return %c0_i32, %c0_i32_0 : i32, i32
  }
  func.func @transform_3(%arg0: i32) -> (i32, i32) {
    %c0_i32 = arith.constant 0 : i32
    %c0_i32_0 = arith.constant 0 : i32
    %c0_i32_1 = arith.constant 0 : i32
    return %c0_i32, %c0_i32_0 : i32, i32
  }
  func.func @transform_4(%arg0: i32) -> (i32, i32) {
    %c0_i32 = arith.constant 0 : i32
    %c0_i32_0 = arith.constant 0 : i32
    %c0_i32_1 = arith.constant 0 : i32
    return %c0_i32, %c0_i32_0 : i32, i32
  }
  func.func @transform_5(%arg0: i32) -> (i32, i32) {
    %c0_i32 = arith.constant 0 : i32
    %c0_i32_0 = arith.constant 0 : i32
    %c0_i32_1 = arith.constant 0 : i32
    return %c0_i32, %c0_i32_0 : i32, i32
  }
  func.func @transform_6(%arg0: i32) -> (i32, i32) {
    %c0_i32 = arith.constant 0 : i32
    %c0_i32_0 = arith.constant 0 : i32
    %c0_i32_1 = arith.constant 0 : i32
    return %c0_i32, %c0_i32_0 : i32, i32
  }
}

</mosaic_0001>

<bundles_post_ra>
// kernel: tpu_custom_call.1
= control target key start
LH: loop header
LB: loop body
LE: loop exit
PB: predicated region body
PF: predicated region fallthrough
CT: control target
= control target key end

     0   :  { %12 = vsyncpa [#allocation3], 0  ;;  %vm40_vm0 = vcmask 1046528   ;;  %vm36_vm1 = vcmask 56320   ;;  %v319_v1 = vmov 0.0   ;;  %vm320_vm2 = vmmov 0   ;;  %s409_s0 = inlined_call_operand.vmem [shape: f32[8,4,7], index: 0, kind: input, shape index: {}]   ;;  %s410_s1 = inlined_call_operand.vmem [shape: f32[7,32], index: 1, kind: input, shape index: {}]   ;;  %s411_s2 = inlined_call_operand.vmem [shape: f32[32,32], index: 2, kind: input, shape index: {}]   ;;  %s412_s3 = inlined_call_operand.vmem [shape: f32[1,32], index: 3, kind: input, shape index: {}]   ;;  %s413_s4 = inlined_call_operand.vmem [shape: f32[1,32], index: 4, kind: input, shape index: {}]   ;;  %s414_s5 = inlined_call_operand.hbm [shape: f32[4,32], index: 5, kind: output, shape index: {0}]   ;;  %s415_s6 = inlined_call_operand.hbm [shape: f32[4,32], index: 6, kind: output, shape index: {1}]  }
   0x1   :  { %v28_v0 = vld [vmem:[%s410_s1] sm:$0x7f]  ;;  %244 = vmatprep.subr.mxu0 %v319_v1  ;;  %246 = vmatprep.mubr.msk.f32.mxu0 %vm320_vm2, %v319_v1  ;;  %v231_v2 = vld [vmem:[%s409_s0 + $0x1c] sm:$0xf]  ;;  %v118_v4 = vld [vmem:[%s411_s2 + $0x8] sm:$0xff]  ;;  %v321_v5 = vmov 0.0|0.0  }
   0x2   :  { %v117_v3 = vld [vmem:[%s411_s2] sm:$0xff]  ;;  %245 = vmatpush3.msk.msra.mxu0 %vm40_vm0, %v28_v0  ;;  %260 = vmatprep.subr.bf16.mxu1 %v321_v5 }
   0x3   :  { %v261_v6 = vpack.c.bf16 %v118_v4, %v117_v3 }
   0x4   :  { %13 = vsyncpa [#allocation5], 0  ;;  %247 = vmatmul.mubr.msk.f32.vlgmr.msra.gmra.mrb[0].mxu0 %vm36_vm1, %v231_v2  ;;  %257 = vmatprep.mubr.msk.f32.mxu1 %vm320_vm2, %v319_v1  ;;  %v119_v7 = vld [vmem:[%s411_s2 + $0x10] sm:$0xff]  ;;  %v120_v8 = vld [vmem:[%s411_s2 + $0x18] sm:$0xff]  ;;  %vm128_vm3 = vcmask 261120   ;;  %vm115_vm4 = vcmask 257024  }
   0x5   :  { %262 = vmatpush3.bf16.msra.mxu1 %v261_v6  ;;  %v264_v9 = vpack.c.bf16 %v120_v8, %v119_v7  ;;  %v232_v10 = vld [vmem:[%s412_s3] ss:$0 sm:$0xff]  ;;  %s322_s9 = smov [#allocation4]  }
   0x6   :  { %263 = vmatprep.subr.bf16.mxu1 %v321_v5  ;;  %s219_s10 = sshll.u32 %s322_s9, 4  ;;  %s220_s10 = int_to_ptr.vmem [resolvable:$true] %s219_s10 }
   0x7   :  { %s271_s11 = scalar_lea.vmem %s220_s10, 64  ;;  %p276_p1 = scmp.lt.s32.totalorder %s220_s10, %s220_s10 }
   0x8   :  { %p272_p0 = scmp.ne.s32.totalorder %s220_s10, %s271_s11  ;;  %p277_p2 = scmp.lt.s32.totalorder %s271_s11, %s271_s11 }
   0x9   :  { %265 = vmatpush3.bf16.msra.mxu1 %v264_v9 }
   0xa   :  { %p278_p3 = por %p277_p2, %p276_p1 }
   0xc   :  { %p279_p4 = pnand %p278_p3, %p272_p0 }
  0xd7   :  { %v110_v11 = vpop.f32.mrb[0].mxu0 }
  0xd8   :  { %v111_v12 = vadd.f32 %v232_v10, %v110_v11  ;;  %v248_v13 = vpop.f32.mrb[1].mxu0 }
  0xda   :  { %v114_v14 = vmax.f32 %v111_v12, 0.0 }
  0xdc   :  { %258 = vmatmul.mubr.msk.f32.vlgmr.msra.gmra.mrb[0].mxu1 %vm128_vm3, %v114_v14  ;;  %116 = vst.msk [vmem:[#allocation4] sm:$0xf] %vm115_vm4, %v114_v14 }
  0xdd   :  { %282 = shalt.err (!%p279_p4)
}
  0xde   :  { %s283_s12 = scalar_lea.hbm %s415_s6, 64 }
  0xdf   :  { %p284_p5 = scmp.ne.s32.totalorder %s415_s6, %s283_s12  ;;  %p287_p6 = scmp.lt.u32.totalorder %s283_s12, %s415_s6 }
  0xe1   :  { %p289_p7 = pnand %p287_p6, %p284_p5 }
  0xe3   :  { %292 = shalt.err (!%p289_p7)
}
  0xe4   :  { %222 = dma.vmem_to_hbm [thread:$0]  %s220_s10, 64, %s415_s6, [#allocation5]   ;;  %v235_v15 = vld [vmem:[%s413_s4] ss:$0 sm:$0xff] }
  0xe5   :  { %s323_s21 = smov [#allocation2]  }
  0xe6   :  { %s209_s22 = sshll.u32 %s323_s21, 4  ;;  %s210_s22 = int_to_ptr.vmem [resolvable:$true] %s209_s22 }
  0xe7   :  { %s293_s23 = scalar_lea.vmem %s210_s22, 64  ;;  %p298_p9 = scmp.lt.s32.totalorder %s210_s22, %s210_s22 }
  0xe8   :  { %p294_p8 = scmp.ne.s32.totalorder %s210_s22, %s293_s23  ;;  %p299_p10 = scmp.lt.s32.totalorder %s293_s23, %s293_s23 }
  0xea   :  { %p300_p11 = por %p299_p10, %p298_p9 }
  0xec   :  { %p301_p12 = pnand %p300_p11, %p294_p8 }
 0x1af   :  { %v198_v16 = vpop.f32.mrb[0].mxu1 }
 0x1b0   :  { %v199_v17 = vadd.f32 %v235_v15, %v198_v16  ;;  %v259_v18 = vpop.f32.mrb[1].mxu1 }
 0x1b2   :  { %202 = vst.msk [vmem:[#allocation2] sm:$0xf] %vm115_vm4, %v199_v17 }
 0x1b3   :  { %304 = shalt.err (!%p301_p12)
}
 0x1b4   :  { %s305_s25 = scalar_lea.hbm %s414_s5, 64 }
 0x1b5   :  { %p306_p13 = scmp.ne.s32.totalorder %s414_s5, %s305_s25  ;;  %p309_p0 = scmp.lt.u32.totalorder %s305_s25, %s414_s5 }
 0x1b7   :  { %p311_p1 = pnand %p309_p0, %p306_p13 }
 0x1b9   :  { %314 = shalt.err (!%p311_p1)
}
 0x1ba   :  { %212 = dma.vmem_to_hbm [thread:$0]  %s210_s22, 64, %s414_s5, [#allocation3]  }
 0x1bb   :  { %315 = dma.done.wait [#allocation3], 64  }
 0x1bc   :  { %316 = vsyncadd [#allocation3], 4294967232 }
 0x1bd   :  { %317 = dma.done.wait [#allocation5], 64  }
 0x1be   :  { %318 = vsyncadd [#allocation5], 4294967232 }
 0x1bf   :  { %229 = vsyncpa [#allocation3], 1 }
 0x1c0   :  { %230 = vsyncpa [#allocation5], 1 }

</bundles_post_ra>
